<compile_context>
chip_gen: v7x
topology: tpu7x:2x2x1
jax: 0.10.0
libtpu: 0.0.40
codegen_flags: <defaults>
</compile_context>

<pallas_src>
import jax
import jax.numpy as jnp
from jax import lax
from jax.experimental import pallas as pl
from jax.experimental.pallas import tpu as pltpu

HIDDEN = 128


def _round_up(n: int, m: int) -> int:
    return ((n + m - 1) // m) * m


def qnetwork_kernel(x_ref, w1_ref, b12_ref, w2_ref, w3_ref, b3_ref, o_ref):
    # Layer 1: Linear(in_size, 128) + ReLU   (bf16 operands, f32 accumulate)
    h1 = jnp.dot(x_ref[...], w1_ref[...], preferred_element_type=jnp.float32)
    h1 = jnp.maximum(h1 + b12_ref[0:1, :], 0.0)

    # Layer 2: Linear(128, 128) + ReLU
    h2 = jnp.dot(h1.astype(jnp.bfloat16), w2_ref[...],
                 preferred_element_type=jnp.float32)
    h2 = jnp.maximum(h2 + b12_ref[1:2, :], 0.0)

    # Layer 3 (transposed): out^T = w3(out_pad,128) . h2(tb,128)^T -> (out_pad, tb)
    # Lane axis = batch (dense); sublane axis = padded out_size.
    out_t = lax.dot_general(
        w3_ref[...], h2.astype(jnp.bfloat16),
        dimension_numbers=(((1,), (1,)), ((), ())),
        preferred_element_type=jnp.float32)
    o_ref[...] = (out_t + b3_ref[...]).astype(o_ref.dtype)


def prepare_qnetwork_params(params):
    """One-time preprocessing: bf16 casts, static padding, bias packing."""
    bf = jnp.bfloat16
    in_size = params["w1t"].shape[0]
    out_size = params["w3t"].shape[1]
    out_pad = _round_up(out_size, 8)          # sublane-aligned transposed output

    w1 = params["w1t"].astype(bf)                                   # (in, 128)
    w2 = params["w2t"].astype(bf)                                   # (128, 128)
    b12 = jnp.concatenate([params["b1"], params["b2"]], axis=0)     # (2, 128) f32
    # PyTorch (out, in) layout for the transposed layer-3 matmul, padded on out.
    w3 = jnp.zeros((out_pad, HIDDEN), bf).at[:out_size, :].set(
        params["w3t"].T.astype(bf))                                 # (out_pad, 128)
    b3 = jnp.zeros((out_pad, 1), jnp.float32).at[:out_size, 0].set(
        params["b3"][0])                                            # (out_pad, 1)

    return {"w1": w1, "w2": w2, "w3": w3, "b12": b12, "b3": b3,
            "in_size": in_size, "out_size": out_size, "out_pad": out_pad}


def qnetwork_forward(x, prepared, *, tb: int = 512):
    """x: (B, input_size) float32. prepared: output of prepare_qnetwork_params."""
    w1, w2, w3 = prepared["w1"], prepared["w2"], prepared["w3"]
    b12, b3 = prepared["b12"], prepared["b3"]
    out_size, out_pad = prepared["out_size"], prepared["out_pad"]

    B, in_size = x.shape
    assert in_size == prepared["in_size"]

    # ---- batch tile selection -------------------------------------------
    b_ceil = _round_up(B, 16)                 # 16 = bf16 sublane pack
    if b_ceil <= tb:
        tb_eff = b_ceil                       # one small grid step, no 128-row inflation
    else:
        tb_eff = max(128, (tb // 128) * 128)  # multi-step: output lane dim must be 128-dense
        steps = -(-B // tb_eff)
        if steps > 1 and steps % 2 == 1 and tb_eff % 256 == 0:
            tb_eff //= 2                      # even step count -> both v7x TensorCores busy
    b_pad = _round_up(B, tb_eff)
    grid = (b_pad // tb_eff,)

    # ---- per-call input prep: bf16 cast + (small) batch-row pad only -----
    x_bf = x.astype(jnp.bfloat16)
    if b_pad == B:
        x_p = x_bf
    else:
        x_p = jnp.zeros((b_pad, in_size), jnp.bfloat16).at[:B, :].set(x_bf)

    flops = 2 * b_pad * (in_size * HIDDEN + HIDDEN * HIDDEN + HIDDEN * out_pad)
    bytes_accessed = (
        2 * (x_p.size + w1.size + w2.size + w3.size)   # bf16 streams
        + 4 * (b12.size + b3.size)                     # f32 biases
        + 4 * out_pad * b_pad                          # f32 transposed output
    )

    out_t_padded = pl.pallas_call(
        qnetwork_kernel,
        out_shape=jax.ShapeDtypeStruct((out_pad, b_pad), jnp.float32),
        grid=grid,
        in_specs=[
            pl.BlockSpec((tb_eff, in_size), lambda i: (i, 0)),   # x tile streams
            pl.BlockSpec(w1.shape, lambda i: (0, 0)),            # weights resident
            pl.BlockSpec(b12.shape, lambda i: (0, 0)),
            pl.BlockSpec(w2.shape, lambda i: (0, 0)),
            pl.BlockSpec(w3.shape, lambda i: (0, 0)),
            pl.BlockSpec(b3.shape, lambda i: (0, 0)),
        ],
        out_specs=pl.BlockSpec((out_pad, tb_eff), lambda i: (0, i)),
        compiler_params=pltpu.CompilerParams(
            dimension_semantics=("parallel",)),
        cost_estimate=pl.CostEstimate(
            flops=int(flops), transcendentals=0,
            bytes_accessed=int(bytes_accessed)),
    )(x_p, w1, b12, w2, w3, b3)

    # Un-transpose + strip padding (tiny array, cheap).
    return out_t_padded[:out_size, :B].T


def init_qnetwork_params(key, input_size, output_size):
    """Deterministic init mimicking nn.Linear's uniform(-1/sqrt(fan_in), +1/sqrt(fan_in))."""
    ks = jax.random.split(key, 6)

    def linear_params(kw, kb, fan_in, fan_out):
        bound = 1.0 / jnp.sqrt(float(fan_in))
        # PyTorch weight is (out, in); we store the transpose (in, out) for x @ W^T.
        w_t = jax.random.uniform(kw, (fan_in, fan_out), jnp.float32, -bound, bound)
        b = jax.random.uniform(kb, (1, fan_out), jnp.float32, -bound, bound)
        return w_t, b

    w1t, b1 = linear_params(ks[0], ks[1], input_size, HIDDEN)
    w2t, b2 = linear_params(ks[2], ks[3], HIDDEN, HIDDEN)
    w3t, b3 = linear_params(ks[4], ks[5], HIDDEN, output_size)
    return {"w1t": w1t, "b1": b1, "w2t": w2t, "b2": b2, "w3t": w3t, "b3": b3}


def qnetwork_reference_bf16(x, params):
    """Matches the kernel's numerics: bf16 operands, f32 accumulation."""
    bf = jnp.bfloat16
    h1 = jnp.maximum(
        jnp.dot(x.astype(bf), params["w1t"].astype(bf),
                preferred_element_type=jnp.float32) + params["b1"], 0.0)
    h2 = jnp.maximum(
        jnp.dot(h1.astype(bf), params["w2t"].astype(bf),
                preferred_element_type=jnp.float32) + params["b2"], 0.0)
    return jnp.dot(h2.astype(bf), params["w3t"].astype(bf),
                   preferred_element_type=jnp.float32) + params["b3"]


def qnetwork_reference_f32(x, params):
    h1 = jnp.maximum(x @ params["w1t"] + params["b1"], 0.0)
    h2 = jnp.maximum(h1 @ params["w2t"] + params["b2"], 0.0)
    return h2 @ params["w3t"] + params["b3"]


if __name__ == "__main__":
    key = jax.random.PRNGKey(0)
    k_params, k_x1, k_x2 = jax.random.split(key, 3)

    input_size = 16   # small RL observation vector
    output_size = 4   # number of discrete actions

    params = init_qnetwork_params(k_params, input_size, output_size)
    prepared = prepare_qnetwork_params(params)

    # --- small (acting) batch: single small grid step, no 128-row inflation ---
    batch = 8
    x = jax.random.normal(k_x1, (batch, input_size), jnp.float32)
    out = jax.block_until_ready(qnetwork_forward(x, prepared))
    assert out.shape == (batch, output_size)
    ref_bf16 = qnetwork_reference_bf16(x, params)
    assert jnp.allclose(out, ref_bf16, atol=1e-3, rtol=1e-3), "mismatch vs bf16 reference"
    ref_f32 = qnetwork_reference_f32(x, params)
    assert jnp.allclose(out, ref_f32, atol=1e-1, rtol=1e-1), "mismatch vs f32 reference"

    # --- multi-tile batch path (exercises grid > 1 with 128-wide tiles) ---
    batch2 = 300
    x2 = jax.random.normal(k_x2, (batch2, input_size), jnp.float32)
    out2 = jax.block_until_ready(qnetwork_forward(x2, prepared, tb=128))
    assert out2.shape == (batch2, output_size)
    ref2 = qnetwork_reference_bf16(x2, params)
    assert jnp.allclose(out2, ref2, atol=1e-3, rtol=1e-3), "mismatch on multi-tile path"

    print("KERNEL_OK")
</pallas_src>

<mosaic_0001>
module attributes {stable_mosaic.version = 11 : i64} {
  func.func @qnetwork_kernel(%arg0: i32, %arg1: memref<16x16xbf16, #tpu.memory_space<vmem>>, %arg2: memref<16x128xbf16, #tpu.memory_space<vmem>>, %arg3: memref<2x128xf32, #tpu.memory_space<vmem>>, %arg4: memref<128x128xbf16, #tpu.memory_space<vmem>>, %arg5: memref<8x128xbf16, #tpu.memory_space<vmem>>, %arg6: memref<8x1xf32, #tpu.memory_space<vmem>>, %arg7: memref<8x16xf32, #tpu.memory_space<vmem>>) attributes {dimension_semantics = [#tpu.dimension_semantics<parallel>], iteration_bounds = array<i64: 1>, scalar_prefetch = 0 : i64, scratch_operands = 0 : i64, tpu.core_type = #tpu.core_type<tc>, window_params = [{transform_indices = @transform_0, window_bounds = array<i64: 16, 16>}, {pipeline_mode = #tpu.pipeline_mode<synchronous>, transform_indices = @transform_1, window_bounds = array<i64: 16, 128>}, {pipeline_mode = #tpu.pipeline_mode<synchronous>, transform_indices = @transform_2, window_bounds = array<i64: 2, 128>}, {pipeline_mode = #tpu.pipeline_mode<synchronous>, transform_indices = @transform_3, window_bounds = array<i64: 128, 128>}, {pipeline_mode = #tpu.pipeline_mode<synchronous>, transform_indices = @transform_4, window_bounds = array<i64: 8, 128>}, {pipeline_mode = #tpu.pipeline_mode<synchronous>, transform_indices = @transform_5, window_bounds = array<i64: 8, 1>}, {transform_indices = @transform_6, window_bounds = array<i64: 8, 16>}]} {
    %c0 = arith.constant 0 : index
    %c0_0 = arith.constant 0 : index
    %0 = vector.load %arg1[%c0, %c0_0] : memref<16x16xbf16, #tpu.memory_space<vmem>>, vector<16x16xbf16>
    %c0_1 = arith.constant 0 : index
    %c0_2 = arith.constant 0 : index
    %1 = vector.load %arg2[%c0_1, %c0_2] : memref<16x128xbf16, #tpu.memory_space<vmem>>, vector<16x128xbf16>
    %cst = arith.constant dense<0.000000e+00> : vector<16x128xf32>
    %2 = tpu.matmul %0, %1, %cst {dimension_numbers = #tpu.dot_dimension_numbers<[1], [0], [0], [1], [0, 0, 1, 1], [], []>} : vector<16x16xbf16>, vector<16x128xbf16>, vector<16x128xf32> -> vector<16x128xf32>
    %c0_3 = arith.constant 0 : index
    %c0_4 = arith.constant 0 : index
    %3 = vector.load %arg3[%c0_3, %c0_4] : memref<2x128xf32, #tpu.memory_space<vmem>>, vector<1x128xf32>
    %4 = vector.broadcast %3 : vector<1x128xf32> to vector<16x128xf32>
    %5 = arith.addf %2, %4 : vector<16x128xf32>
    %cst_5 = arith.constant 0.000000e+00 : f32
    %6 = vector.broadcast %cst_5 : f32 to vector<16x128xf32>
    %7 = arith.maximumf %5, %6 : vector<16x128xf32>
    %8 = arith.truncf %7 : vector<16x128xf32> to vector<16x128xbf16>
    %c0_6 = arith.constant 0 : index
    %c0_7 = arith.constant 0 : index
    %9 = vector.load %arg4[%c0_6, %c0_7] : memref<128x128xbf16, #tpu.memory_space<vmem>>, vector<128x128xbf16>
    %cst_8 = arith.constant dense<0.000000e+00> : vector<16x128xf32>
    %10 = tpu.matmul %8, %9, %cst_8 {dimension_numbers = #tpu.dot_dimension_numbers<[1], [0], [0], [1], [0, 0, 1, 1], [], []>} : vector<16x128xbf16>, vector<128x128xbf16>, vector<16x128xf32> -> vector<16x128xf32>
    %c1 = arith.constant 1 : index
    %c0_9 = arith.constant 0 : index
    %11 = vector.load %arg3[%c1, %c0_9] : memref<2x128xf32, #tpu.memory_space<vmem>>, vector<1x128xf32>
    %12 = vector.broadcast %11 : vector<1x128xf32> to vector<16x128xf32>
    %13 = arith.addf %10, %12 : vector<16x128xf32>
    %cst_10 = arith.constant 0.000000e+00 : f32
    %14 = vector.broadcast %cst_10 : f32 to vector<16x128xf32>
    %15 = arith.maximumf %13, %14 : vector<16x128xf32>
    %c0_11 = arith.constant 0 : index
    %c0_12 = arith.constant 0 : index
    %16 = vector.load %arg5[%c0_11, %c0_12] : memref<8x128xbf16, #tpu.memory_space<vmem>>, vector<8x128xbf16>
    %17 = arith.truncf %15 : vector<16x128xf32> to vector<16x128xbf16>
    %cst_13 = arith.constant dense<0.000000e+00> : vector<8x16xf32>
    %18 = tpu.matmul %16, %17, %cst_13 {dimension_numbers = #tpu.dot_dimension_numbers<[1], [1], [0], [0], [0, 0, 1, 0], [], []>} : vector<8x128xbf16>, vector<16x128xbf16>, vector<8x16xf32> -> vector<8x16xf32>
    %c0_14 = arith.constant 0 : index
    %c0_15 = arith.constant 0 : index
    %19 = vector.load %arg6[%c0_14, %c0_15] : memref<8x1xf32, #tpu.memory_space<vmem>>, vector<8x1xf32>
    %20 = vector.broadcast %19 : vector<8x1xf32> to vector<8x16xf32>
    %21 = arith.addf %18, %20 : vector<8x16xf32>
    %c0_16 = arith.constant 0 : index
    %c0_17 = arith.constant 0 : index
    %22 = vector.load %arg7[%c0_16, %c0_17] : memref<8x16xf32, #tpu.memory_space<vmem>>, vector<8x16xf32>
    tpu.vector_store %arg7[%c0_16, %c0_17], %21 {strides = array<i32>} : memref<8x16xf32, #tpu.memory_space<vmem>>, vector<8x16xf32>,
    return
  }
  func.func @transform_0(%arg0: i32) -> (i32, i32) {
    %c0_i32 = arith.constant 0 : i32
    %c0_i32_0 = arith.constant 0 : i32
    return %arg0, %c0_i32 : i32, i32
  }
  func.func @transform_1(%arg0: i32) -> (i32, i32) {
    %c0_i32 = arith.constant 0 : i32
    %c0_i32_0 = arith.constant 0 : i32
    %c0_i32_1 = arith.constant 0 : i32
    return %c0_i32, %c0_i32_0 : i32, i32
  }
  func.func @transform_2(%arg0: i32) -> (i32, i32) {
    %c0_i32 = arith.constant 0 : i32
    %c0_i32_0 = arith.constant 0 : i32
    %c0_i32_1 = arith.constant 0 : i32
    return %c0_i32, %c0_i32_0 : i32, i32
  }
  func.func @transform_3(%arg0: i32) -> (i32, i32) {
    %c0_i32 = arith.constant 0 : i32
    %c0_i32_0 = arith.constant 0 : i32
    %c0_i32_1 = arith.constant 0 : i32
    return %c0_i32, %c0_i32_0 : i32, i32
  }
  func.func @transform_4(%arg0: i32) -> (i32, i32) {
    %c0_i32 = arith.constant 0 : i32
    %c0_i32_0 = arith.constant 0 : i32
    %c0_i32_1 = arith.constant 0 : i32
    return %c0_i32, %c0_i32_0 : i32, i32
  }
  func.func @transform_5(%arg0: i32) -> (i32, i32) {
    %c0_i32 = arith.constant 0 : i32
    %c0_i32_0 = arith.constant 0 : i32
    %c0_i32_1 = arith.constant 0 : i32
    return %c0_i32, %c0_i32_0 : i32, i32
  }
  func.func @transform_6(%arg0: i32) -> (i32, i32) {
    %c0_i32 = arith.constant 0 : i32
    %c0_i32_0 = arith.constant 0 : i32
    return %c0_i32, %arg0 : i32, i32
  }
}

</mosaic_0001>

<bundles_post_ra>
// kernel: tpu_custom_call.1
= control target key start
LH: loop header
LB: loop body
LE: loop exit
PB: predicated region body
PF: predicated region fallthrough
CT: control target
= control target key end

     0   :  { %11 = vsyncpa [#allocation3], 0  ;;  %s543_s0 = inlined_call_operand.vmem [shape: bf16[16,16], index: 0, kind: input, shape index: {}]   ;;  %s544_s1 = inlined_call_operand.hbm [shape: bf16[16,128], index: 1, kind: input, shape index: {}]   ;;  %s545_s2 = inlined_call_operand.vmem [shape: f32[2,128], index: 2, kind: input, shape index: {}]   ;;  %s546_s3 = inlined_call_operand.hbm [shape: bf16[128,128], index: 3, kind: input, shape index: {}]   ;;  %s547_s4 = inlined_call_operand.vmem [shape: bf16[8,128], index: 4, kind: input, shape index: {}]   ;;  %s548_s5 = inlined_call_operand.vmem [shape: f32[8,1], index: 5, kind: input, shape index: {}]   ;;  %s549_s6 = inlined_call_operand.hbm [shape: f32[8,16], index: 6, kind: output, shape index: {}]  }
   0x1   :  { %12 = vsyncpa [#allocation6], 0 }
   0x2   :  { %13 = vsyncpa [#allocation4], 0  ;;  %s447_s21 = smov [#allocation2]   ;;  %s375_s25 = scalar_lea.hbm %s544_s1, 128 }
   0x3   :  { %s21_s22 = sshll.u32 %s447_s21, 4  ;;  %p376_p0 = scmp.ne.s32.totalorder %s544_s1, %s375_s25  ;;  %s22_s22 = int_to_ptr.vmem [resolvable:$true] %s21_s22 }
   0x4   :  { %p379_p1 = scmp.lt.u32.totalorder %s375_s25, %s544_s1 }
   0x6   :  { %p381_p2 = pnand %p379_p1, %p376_p0 }
   0x8   :  { %384 = shalt.err (!%p381_p2)
}
   0x9   :  { %s385_s30 = scalar_lea.vmem %s22_s22, 128  ;;  %p390_p4 = scmp.lt.s32.totalorder %s22_s22, %s22_s22 }
   0xa   :  { %p386_p3 = scmp.ne.s32.totalorder %s22_s22, %s385_s30  ;;  %p391_p5 = scmp.lt.s32.totalorder %s385_s30, %s385_s30 }
   0xc   :  { %p392_p6 = por %p391_p5, %p390_p4 }
   0xe   :  { %p393_p7 = pnand %p392_p6, %p386_p3 }
  0x10   :  { %396 = shalt.err (!%p393_p7)
}
  0x11   :  { %s448_s7 = smov 64   ;;  %s449_s8 = smov 4  }
  0x12   :  { %27 = dma.hbm_to_vmem [thread:$0]  %s544_s1, 128, %s22_s22, [#allocation3], %s448_s7, %s448_s7, %s449_s8  }
  0x13   :  { %s450_s11 = smov [#allocation5]   ;;  %s397_s15 = scalar_lea.hbm %s546_s3, 1024 }
  0x14   :  { %s35_s12 = sshll.u32 %s450_s11, 4  ;;  %p398_p8 = scmp.ne.s32.totalorder %s546_s3, %s397_s15  ;;  %s36_s12 = int_to_ptr.vmem [resolvable:$true] %s35_s12 }
  0x15   :  { %p401_p9 = scmp.lt.u32.totalorder %s397_s15, %s546_s3 }
  0x17   :  { %p403_p10 = pnand %p401_p9, %p398_p8 }
  0x19   :  { %406 = shalt.err (!%p403_p10)
}
  0x1a   :  { %s407_s20 = scalar_lea.vmem %s36_s12, 1024  ;;  %p412_p12 = scmp.lt.s32.totalorder %s36_s12, %s36_s12 }
  0x1b   :  { %p408_p11 = scmp.ne.s32.totalorder %s36_s12, %s407_s20  ;;  %p413_p13 = scmp.lt.s32.totalorder %s407_s20, %s407_s20 }
  0x1d   :  { %p414_p0 = por %p413_p13, %p412_p12 }
  0x1f   :  { %p415_p1 = pnand %p414_p0, %p408_p11 }
  0x21   :  { %418 = shalt.err (!%p415_p1)
}
  0x22   :  { %41 = dma.hbm_to_vmem [thread:$0]  %s546_s3, 1024, %s36_s12, [#allocation6], %s448_s7, %s448_s7, %s449_s8  }
  0x23   :  { %441 = dma.done.wait [#allocation3], 128  }
  0x24   :  { %442 = vsyncadd [#allocation3], 4294967168 }
  0x25   :  { %443 = dma.done.wait [#allocation6], 1024  }
  0x26   :  { %444 = vsyncadd [#allocation6], 4294966272  ;;  %v451_v0 = vmov 0.0   ;;  %vm452_vm0 = vmmov 0   ;;  %v365_v1 = vld [vmem:[#allocation2] sm:$0xff]   ;;  %vm73_vm1 = vcmask 130048  }
  0x27   :  { %324 = vmatprep.subr.bf16.mxu0 %v451_v0  ;;  %326 = vmatprep.mubr.msk.bf16.mxu0 %vm452_vm0, %v451_v0  ;;  %v366_v2 = vld [vmem:[%s543_s0] sm:$0xff]   ;;  %v367_v3 = vld [vmem:[#allocation5] sm:$0xff]   ;;  %v368_v4 = vld [vmem:[#allocation5 + $0x8] sm:$0xff]   ;;  %v453_v22 = vmov 0  }
  0x28   :  { %330 = vmatprep.subr.bf16.mxu1 %v451_v0  ;;  %346 = vmatprep.mubr.msk.bf16.mxu1 %vm452_vm0, %v451_v0  ;;  %v369_v5 = vld [vmem:[#allocation5 + $0x10] sm:$0xff]   ;;  %v370_v6 = vld [vmem:[#allocation5 + $0x18] sm:$0xff]   ;;  %v371_v7 = vld [vmem:[#allocation5 + $0x20] sm:$0xff]  }
  0x29   :  { %325 = vmatpush3.bf16.msra.mxu0 %v365_v1  ;;  %331 = vmatpush3.bf16.msra.mxu1 %v367_v3  ;;  %v372_v8 = vld [vmem:[#allocation5 + $0x28] sm:$0xff]   ;;  %v373_v9 = vld [vmem:[#allocation5 + $0x30] sm:$0xff]   ;;  %v374_v10 = vld [vmem:[#allocation5 + $0x38] sm:$0xff]  }
  0x2a   :  { %350 = vmatprep.subr.bf16.mxu0 %v451_v0  ;;  %332 = vmatprep.subr.bf16.mxu1 %v451_v0  ;;  %v298_v11 = vld [vmem:[%s545_s2] ss:$0 sm:$0xff]  ;;  %v302_v23 = vld [vmem:[%s545_s2 + $0x1] ss:$0 sm:$0xff] }
  0x2b   :  { %v235_v21 = vld [vmem:[%s548_s5] sm:$0xff]  ;;  %364 = vset.pattern.permute.xlu0 %v453_v22  ;;  %s454_s5 = smov [#allocation7]  }
  0x2c   :  { %327 = vmatmul.mubr.msk.bf16.vlgmr.msra.gmra.mrb[0].mxu0 %vm73_vm1, %v366_v2  ;;  %238 = vperm.xlu0 %364, %v235_v21   ;;  %v233_v33 = vld [vmem:[%s547_s4] sm:$0xf]  ;;  %s288_s30 = sshll.u32 %s454_s5, 4  ;;  %s289_s30 = int_to_ptr.vmem [resolvable:$true] %s288_s30 }
  0x2d   :  { %352 = vmatprep.mubr.msk.bf16.mxu0 %vm452_vm0, %v451_v0  ;;  %333 = vmatpush3.bf16.msra.mxu1 %v368_v4  ;;  %s419_s2 = scalar_lea.vmem %s289_s30, 128  ;;  %p424_p3 = scmp.lt.s32.totalorder %s289_s30, %s289_s30 }
  0x2e   :  { %334 = vmatprep.subr.bf16.mxu1 %v451_v0  ;;  %p420_p2 = scmp.ne.s32.totalorder %s289_s30, %s419_s2  ;;  %p425_p4 = scmp.lt.s32.totalorder %s419_s2, %s419_s2 }
  0x30   :  { %p426_p5 = por %p425_p4, %p424_p3 }
  0x31   :  { %335 = vmatpush3.bf16.msra.mxu1 %v369_v5 }
  0x32   :  { %336 = vmatprep.subr.bf16.mxu1 %v451_v0  ;;  %p427_p6 = pnand %p426_p5, %p420_p2 }
  0x35   :  { %337 = vmatpush3.bf16.msra.mxu1 %v370_v6 }
  0x36   :  { %338 = vmatprep.subr.bf16.mxu1 %v451_v0 }
  0x39   :  { %339 = vmatpush3.bf16.msra.mxu1 %v371_v7 }
  0x3a   :  { %340 = vmatprep.subr.bf16.mxu1 %v451_v0 }
  0x3d   :  { %341 = vmatpush3.bf16.msra.mxu1 %v372_v8 }
  0x3e   :  { %342 = vmatprep.subr.bf16.mxu1 %v451_v0 }
  0x41   :  { %343 = vmatpush3.bf16.msra.mxu1 %v373_v9 }
  0x42   :  { %344 = vmatprep.subr.bf16.mxu1 %v451_v0 }
  0x45   :  { %345 = vmatpush3.bf16.msra.mxu1 %v374_v10 }
  0xab   :  { %v239_v34 = vpop.permute.xlu0 %238 }
  0xff   :  { %v111_v12 = vpop.f32.mrb[0].mxu0 }
 0x100   :  { %v112_v13 = vadd.f32 %v298_v11, %v111_v12  ;;  %v328_v14 = vpop.f32.mrb[1].mxu0 }
 0x101   :  { %v114_v15 = vpop.f32.mrb[2].mxu0 }
 0x102   :  { %v115_v16 = vadd.f32 %v298_v11, %v114_v15  ;;  %v329_v17 = vpop.f32.mrb[3].mxu0  ;;  %v118_v18 = vmax.f32 %v112_v13, 0.0 }
 0x104   :  { %v119_v19 = vmax.f32 %v115_v16, 0.0 }
 0x106   :  { %v120_v20 = vpack.c.bf16 %v119_v19, %v118_v18 }
 0x108   :  { %347 = vmatmul.mubr.bf16.vlgmr.msra.gmra.mrb[0].mxu1 %v120_v20 }
 0x1db   :  { %v224_v24 = vpop.f32.mrb[0].mxu1 }
 0x1dc   :  { %v225_v25 = vadd.f32 %v302_v23, %v224_v24  ;;  %v348_v26 = vpop.f32.mrb[1].mxu1 }
 0x1dd   :  { %v227_v27 = vpop.f32.mrb[2].mxu1 }
 0x1de   :  { %v228_v28 = vadd.f32 %v302_v23, %v227_v27  ;;  %v349_v29 = vpop.f32.mrb[3].mxu1  ;;  %v231_v30 = vmax.f32 %v225_v25, 0.0 }
 0x1e0   :  { %v232_v31 = vmax.f32 %v228_v28, 0.0 }
 0x1e2   :  { %v234_v32 = vpack.c.bf16 %v232_v31, %v231_v30 }
 0x1e4   :  { %351 = vmatpush3.bf16.xpose.msra.mxu0 %v234_v32 }
 0x1eb   :  { %353 = vmatmul.mubr.bf16.vlgmr.msra.gmra.mrb[4].mxu0 %v233_v33 }
 0x2be   :  { %v275_v35 = vpop.f32.mrb[4].mxu0 }
 0x2bf   :  { %v276_v36 = vadd.f32 %v275_v35, %v239_v34  ;;  %v354_v37 = vpop.f32.mrb[5].mxu0 }
 0x2c0   :  { %v278_v38 = vpop.f32.mrb[6].mxu0 }
 0x2c1   :  { %281 = vst.msk [vmem:[#allocation7] sm:$0xff] %vm73_vm1, %v276_v36  ;;  %v355_v39 = vpop.f32.mrb[7].mxu0 }
 0x2c2   :  { %430 = shalt.err (!%p427_p6)
}
 0x2c3   :  { %s431_s8 = scalar_lea.hbm %s549_s6, 128 }
 0x2c4   :  { %p432_p7 = scmp.ne.s32.totalorder %s549_s6, %s431_s8  ;;  %p435_p8 = scmp.lt.u32.totalorder %s431_s8, %s549_s6 }
 0x2c6   :  { %p437_p9 = pnand %p435_p8, %p432_p7 }
 0x2c8   :  { %440 = shalt.err (!%p437_p9)
}
 0x2c9   :  { %291 = dma.vmem_to_hbm [thread:$0]  %s289_s30, 128, %s549_s6, [#allocation4]  }
 0x2ca   :  { %445 = dma.done.wait [#allocation4], 128  }
 0x2cb   :  { %446 = vsyncadd [#allocation4], 4294967168 }
 0x2cc   :  { %295 = vsyncpa [#allocation3], 1 }
 0x2cd   :  { %296 = vsyncpa [#allocation6], 1 }
 0x2ce   :  { %297 = vsyncpa [#allocation4], 1 }

</bundles_post_ra>
